<compile_context>
chip_gen: v7x
topology: tpu7x:2x2x1
jax: 0.10.0
libtpu: 0.0.40
codegen_flags: <defaults>
</compile_context>

<pallas_src>
import functools

import jax
import jax.numpy as jnp
from jax import lax
from jax.experimental import pallas as pl
from jax.experimental.pallas import tpu as pltpu


def disc_kernel(x_ref, w1_ref, b1_ref, w2_ref, b2_ref,
                w3_ref, b3_ref, w4_ref, b4_ref, o_ref):
    # x_ref: (tb, nz) f32 — native PyTorch layout, no wrapper pre-pass.
    # w{1,2,3}_ref: (out, in) f32 (nn.Linear layout); b{1,2,3}_ref: (out, 1).
    # w4_ref: W4^T as (nh, 1); b4_ref: (1, 1).  Output o_ref: (1, tb).
    #
    # Layer 1: h1^T = W1 @ x^T — contract nz (dim 1) of both operands; the
    # small (tb, nz) -> (nz, tb) transpose goes to the XLU (idle here).
    h = lax.dot_general(w1_ref[...], x_ref[...],
                        dimension_numbers=(((1,), (1,)), ((), ())),
                        preferred_element_type=jnp.float32) + b1_ref[...]
    h = jnp.maximum(h, 0.0)                                        # (nh, tb)

    h = jnp.dot(w2_ref[...], h, preferred_element_type=jnp.float32) + b2_ref[...]
    h = jnp.maximum(h, 0.0)

    h = jnp.dot(w3_ref[...], h, preferred_element_type=jnp.float32) + b3_ref[...]
    h = jnp.maximum(h, 0.0)

    # Final nh -> 1 projection on the VPU (mul) + XLU (sublane reduce); avoids
    # an N=1 matmul that would waste a full MXU result column.
    z = jnp.sum(h * w4_ref[...], axis=0, keepdims=True) + b4_ref[...]  # (1, tb)

    # Exact sigmoid: exp on the EUP + one f32 divide over only (1, tb) elems.
    o_ref[...] = 1.0 / (1.0 + jnp.exp(-z))


def _cdiv(a, b):
    return (a + b - 1) // b


def _choose_batch_tile(B, block_b):
    """Pick (batch_tile, padded_B).

    * B < 256: one unpadded grid step (tiny batches, no pad pass at all).
    * B >= 256: tiles are multiples of 128 lanes, chosen so the grid has at
      least 2 steps (keeps both v7x TensorCores busy) and at most block_b per
      step (bounds per-step VMEM / vreg pressure; 1024 default amortizes the
      ~0.35 us per-step overhead to ~85%+ of roofline).
    """
    if B < 256:
        return B, B
    tb = min(block_b, 128 * _cdiv(B, 256))
    Bp = _cdiv(B, tb) * tb
    return tb, Bp


@functools.partial(jax.jit, static_argnames=("block_b",))
def discriminator_forward(x, w1, b1, w2, b2, w3, b3, w4t, b4, block_b=1024):
    """x: (B, nz) f32.  Weights in PyTorch layout (out, in); biases (out, 1);
    w4t is W4^T with shape (nh, 1); b4 is (1, 1).  Returns (B, 1) f32."""
    B, nz = x.shape
    nh = w1.shape[0]

    tb, Bp = _choose_batch_tile(B, block_b)
    if Bp != B:
        # Pad only the ragged tail (pure f32 copy; no cast/transpose pass).
        x = jnp.pad(x, ((0, Bp - B), (0, 0)))

    grid = (Bp // tb,)

    # Trace-time VMEM guard: resident weights (worst case double-buffered by
    # the pipeline) + live f32 activations must fit comfortably in v7x's
    # 64 MiB VMEM.  At nh=32 / tb=1024 this is a few hundred KiB.
    weight_bytes = 4 * (w1.size + w2.size + w3.size + b1.size + b2.size
                        + b3.size + w4t.size + b4.size)
    act_bytes = 4 * (2 * tb * nz + 3 * nh * tb + 2 * tb)
    assert 2 * weight_bytes + act_bytes < 48 * 1024 * 1024, (
        "nhidden/block_b too large for the resident-weight scheme on v7x; "
        "add a hidden-dim grid axis or lower block_b")
    # TODO(synk): for nhidden >~ 2K, tile the hidden dimension instead of
    # keeping W2/W3 fully resident.

    flops = 2 * Bp * (nz * nh + 2 * nh * nh + nh)
    bytes_accessed = 4 * (Bp * nz + Bp) + weight_bytes

    out = pl.pallas_call(
        disc_kernel,
        out_shape=jax.ShapeDtypeStruct((1, Bp), jnp.float32),
        grid=grid,
        in_specs=[
            pl.BlockSpec((tb, nz), lambda i: (i, 0)),   # x tile, PyTorch layout
            pl.BlockSpec((nh, nz), lambda i: (0, 0)),   # W1 (grid-resident)
            pl.BlockSpec((nh, 1),  lambda i: (0, 0)),   # b1
            pl.BlockSpec((nh, nh), lambda i: (0, 0)),   # W2
            pl.BlockSpec((nh, 1),  lambda i: (0, 0)),   # b2
            pl.BlockSpec((nh, nh), lambda i: (0, 0)),   # W3
            pl.BlockSpec((nh, 1),  lambda i: (0, 0)),   # b3
            pl.BlockSpec((nh, 1),  lambda i: (0, 0)),   # W4^T (VPU path)
            pl.BlockSpec((1, 1),   lambda i: (0, 0)),   # b4
        ],
        out_specs=pl.BlockSpec((1, tb), lambda i: (0, i)),   # lane-dense output
        compiler_params=pltpu.CompilerParams(
            dimension_semantics=("parallel",)),
        cost_estimate=pl.CostEstimate(
            flops=flops, transcendentals=Bp, bytes_accessed=bytes_accessed),
    )(x, w1, b1, w2, b2, w3, b3, w4t, b4)

    # Match nn.Module semantics: (B, 1).  (If a downstream loss reduces over
    # the batch, prefer consuming the lane-dense (1, B) slab directly.)
    return out[0, :B][:, None]


def init_params(key, nz, nhidden):
    """PyTorch-style uniform(-1/sqrt(fan_in), 1/sqrt(fan_in)) init, weights in
    nn.Linear layout (out, in), biases as (out, 1)."""
    ks = jax.random.split(key, 8)

    def lin(kw, kb, fan_in, fan_out):
        bound = 1.0 / jnp.sqrt(fan_in)
        w = jax.random.uniform(kw, (fan_out, fan_in), jnp.float32, -bound, bound)
        b = jax.random.uniform(kb, (fan_out, 1), jnp.float32, -bound, bound)
        return w, b

    w1, b1 = lin(ks[0], ks[1], nz, nhidden)
    w2, b2 = lin(ks[2], ks[3], nhidden, nhidden)
    w3, b3 = lin(ks[4], ks[5], nhidden, nhidden)
    w4, b4 = lin(ks[6], ks[7], nhidden, 1)
    return w1, b1, w2, b2, w3, b3, w4.T, b4   # last layer passed as W4^T (nh,1)


def reference_forward(x, w1, b1, w2, b2, w3, b3, w4t, b4):
    """Pure-JAX f32 reference identical to the PyTorch module."""
    h = jnp.maximum(x @ w1.T + b1[:, 0], 0.0)
    h = jnp.maximum(h @ w2.T + b2[:, 0], 0.0)
    h = jnp.maximum(h @ w3.T + b3[:, 0], 0.0)
    return jax.nn.sigmoid(h @ w4t + b4[:, 0])


if __name__ == "__main__":
    key = jax.random.PRNGKey(0)
    k_x, k_x2, k_x3, k_p = jax.random.split(key, 4)

    B, nz, nhidden = 2, 8, 32
    params = init_params(k_p, nz, nhidden)

    # Tiny batch: single grid step, no padding, no pre-pass over x.
    x = jax.random.normal(k_x, (B, nz), jnp.float32)
    out = jax.block_until_ready(discriminator_forward(x, *params))
    ref = reference_forward(x, *params)
    assert out.shape == (B, 1), out.shape
    assert jnp.allclose(out, ref, atol=2e-3, rtol=2e-3), (out, ref)

    # Ragged mid-size batch: pads 300 -> 512, 2 parallel tiles (v7x megacore).
    B2 = 300
    x2 = jax.random.normal(k_x2, (B2, nz), jnp.float32)
    out2 = jax.block_until_ready(discriminator_forward(x2, *params))
    ref2 = reference_forward(x2, *params)
    assert out2.shape == (B2, 1), out2.shape
    assert jnp.allclose(out2, ref2, atol=2e-3, rtol=2e-3)

    # Larger aligned batch: 2 x 512-wide tiles, no padding.
    B3 = 1024
    x3 = jax.random.normal(k_x3, (B3, nz), jnp.float32)
    out3 = jax.block_until_ready(discriminator_forward(x3, *params))
    ref3 = reference_forward(x3, *params)
    assert out3.shape == (B3, 1), out3.shape
    assert jnp.allclose(out3, ref3, atol=2e-3, rtol=2e-3)

    print("KERNEL_OK")
</pallas_src>

<mosaic_0001>
module attributes {stable_mosaic.version = 11 : i64} {
  func.func @disc_kernel(%arg0: i32, %arg1: memref<2x8xf32, #tpu.memory_space<vmem>>, %arg2: memref<32x8xf32, #tpu.memory_space<vmem>>, %arg3: memref<32x1xf32, #tpu.memory_space<vmem>>, %arg4: memref<32x32xf32, #tpu.memory_space<vmem>>, %arg5: memref<32x1xf32, #tpu.memory_space<vmem>>, %arg6: memref<32x32xf32, #tpu.memory_space<vmem>>, %arg7: memref<32x1xf32, #tpu.memory_space<vmem>>, %arg8: memref<32x1xf32, #tpu.memory_space<vmem>>, %arg9: memref<1x1xf32, #tpu.memory_space<vmem>>, %arg10: memref<1x2xf32, #tpu.memory_space<vmem>>) attributes {dimension_semantics = [#tpu.dimension_semantics<parallel>], iteration_bounds = array<i64: 1>, scalar_prefetch = 0 : i64, scratch_operands = 0 : i64, tpu.core_type = #tpu.core_type<tc>, window_params = [{transform_indices = @transform_0, window_bounds = array<i64: 2, 8>}, {pipeline_mode = #tpu.pipeline_mode<synchronous>, transform_indices = @transform_1, window_bounds = array<i64: 32, 8>}, {pipeline_mode = #tpu.pipeline_mode<synchronous>, transform_indices = @transform_2, window_bounds = array<i64: 32, 1>}, {pipeline_mode = #tpu.pipeline_mode<synchronous>, transform_indices = @transform_3, window_bounds = array<i64: 32, 32>}, {pipeline_mode = #tpu.pipeline_mode<synchronous>, transform_indices = @transform_4, window_bounds = array<i64: 32, 1>}, {pipeline_mode = #tpu.pipeline_mode<synchronous>, transform_indices = @transform_5, window_bounds = array<i64: 32, 32>}, {pipeline_mode = #tpu.pipeline_mode<synchronous>, transform_indices = @transform_6, window_bounds = array<i64: 32, 1>}, {pipeline_mode = #tpu.pipeline_mode<synchronous>, transform_indices = @transform_7, window_bounds = array<i64: 32, 1>}, {pipeline_mode = #tpu.pipeline_mode<synchronous>, transform_indices = @transform_8, window_bounds = array<i64: 1, 1>}, {transform_indices = @transform_9, window_bounds = array<i64: 1, 2>}]} {
    %c0 = arith.constant 0 : index
    %c0_0 = arith.constant 0 : index
    %0 = vector.load %arg2[%c0, %c0_0] : memref<32x8xf32, #tpu.memory_space<vmem>>, vector<32x8xf32>
    %c0_1 = arith.constant 0 : index
    %c0_2 = arith.constant 0 : index
    %1 = vector.load %arg1[%c0_1, %c0_2] : memref<2x8xf32, #tpu.memory_space<vmem>>, vector<2x8xf32>
    %cst = arith.constant dense<0.000000e+00> : vector<32x2xf32>
    %2 = tpu.matmul %0, %1, %cst {dimension_numbers = #tpu.dot_dimension_numbers<[1], [1], [0], [0], [0, 0, 1, 0], [], []>} : vector<32x8xf32>, vector<2x8xf32>, vector<32x2xf32> -> vector<32x2xf32>
    %c0_3 = arith.constant 0 : index
    %c0_4 = arith.constant 0 : index
    %3 = vector.load %arg3[%c0_3, %c0_4] : memref<32x1xf32, #tpu.memory_space<vmem>>, vector<32x1xf32>
    %4 = vector.broadcast %3 : vector<32x1xf32> to vector<32x2xf32>
    %5 = arith.addf %2, %4 : vector<32x2xf32>
    %cst_5 = arith.constant 0.000000e+00 : f32
    %6 = vector.broadcast %cst_5 : f32 to vector<32x2xf32>
    %7 = arith.maximumf %5, %6 : vector<32x2xf32>
    %c0_6 = arith.constant 0 : index
    %c0_7 = arith.constant 0 : index
    %8 = vector.load %arg4[%c0_6, %c0_7] : memref<32x32xf32, #tpu.memory_space<vmem>>, vector<32x32xf32>
    %cst_8 = arith.constant dense<0.000000e+00> : vector<32x2xf32>
    %9 = tpu.matmul %8, %7, %cst_8 {dimension_numbers = #tpu.dot_dimension_numbers<[1], [0], [0], [1], [0, 0, 1, 1], [], []>} : vector<32x32xf32>, vector<32x2xf32>, vector<32x2xf32> -> vector<32x2xf32>
    %c0_9 = arith.constant 0 : index
    %c0_10 = arith.constant 0 : index
    %10 = vector.load %arg5[%c0_9, %c0_10] : memref<32x1xf32, #tpu.memory_space<vmem>>, vector<32x1xf32>
    %11 = vector.broadcast %10 : vector<32x1xf32> to vector<32x2xf32>
    %12 = arith.addf %9, %11 : vector<32x2xf32>
    %cst_11 = arith.constant 0.000000e+00 : f32
    %13 = vector.broadcast %cst_11 : f32 to vector<32x2xf32>
    %14 = arith.maximumf %12, %13 : vector<32x2xf32>
    %c0_12 = arith.constant 0 : index
    %c0_13 = arith.constant 0 : index
    %15 = vector.load %arg6[%c0_12, %c0_13] : memref<32x32xf32, #tpu.memory_space<vmem>>, vector<32x32xf32>
    %cst_14 = arith.constant dense<0.000000e+00> : vector<32x2xf32>
    %16 = tpu.matmul %15, %14, %cst_14 {dimension_numbers = #tpu.dot_dimension_numbers<[1], [0], [0], [1], [0, 0, 1, 1], [], []>} : vector<32x32xf32>, vector<32x2xf32>, vector<32x2xf32> -> vector<32x2xf32>
    %c0_15 = arith.constant 0 : index
    %c0_16 = arith.constant 0 : index
    %17 = vector.load %arg7[%c0_15, %c0_16] : memref<32x1xf32, #tpu.memory_space<vmem>>, vector<32x1xf32>
    %18 = vector.broadcast %17 : vector<32x1xf32> to vector<32x2xf32>
    %19 = arith.addf %16, %18 : vector<32x2xf32>
    %cst_17 = arith.constant 0.000000e+00 : f32
    %20 = vector.broadcast %cst_17 : f32 to vector<32x2xf32>
    %21 = arith.maximumf %19, %20 : vector<32x2xf32>
    %c0_18 = arith.constant 0 : index
    %c0_19 = arith.constant 0 : index
    %22 = vector.load %arg8[%c0_18, %c0_19] : memref<32x1xf32, #tpu.memory_space<vmem>>, vector<32x1xf32>
    %23 = vector.broadcast %22 : vector<32x1xf32> to vector<32x2xf32>
    %24 = arith.mulf %21, %23 : vector<32x2xf32>
    %cst_20 = arith.constant dense<0.000000e+00> : vector<2xf32>
    %25 = vector.multi_reduction <add>, %24, %cst_20 [0] : vector<32x2xf32> to vector<2xf32>
    %26 = vector.shape_cast %25 : vector<2xf32> to vector<1x2xf32>
    %c0_21 = arith.constant 0 : index
    %c0_22 = arith.constant 0 : index
    %27 = vector.load %arg9[%c0_21, %c0_22] : memref<1x1xf32, #tpu.memory_space<vmem>>, vector<1x1xf32>
    %28 = vector.broadcast %27 : vector<1x1xf32> to vector<1x2xf32>
    %29 = arith.addf %26, %28 : vector<1x2xf32>
    %cst_23 = arith.constant 0.000000e+00 : f32
    %30 = vector.broadcast %cst_23 : f32 to vector<1x2xf32>
    %31 = arith.subf %30, %29 : vector<1x2xf32>
    %32 = math.exp %31 : vector<1x2xf32>
    %cst_24 = arith.constant 1.000000e+00 : f32
    %33 = vector.broadcast %cst_24 : f32 to vector<1x2xf32>
    %34 = arith.addf %33, %32 : vector<1x2xf32>
    %cst_25 = arith.constant 1.000000e+00 : f32
    %35 = vector.broadcast %cst_25 : f32 to vector<1x2xf32>
    %36 = arith.divf %35, %34 : vector<1x2xf32>
    %c0_26 = arith.constant 0 : index
    %c0_27 = arith.constant 0 : index
    %37 = vector.load %arg10[%c0_26, %c0_27] : memref<1x2xf32, #tpu.memory_space<vmem>>, vector<1x2xf32>
    tpu.vector_store %arg10[%c0_26, %c0_27], %36 {strides = array<i32>} : memref<1x2xf32, #tpu.memory_space<vmem>>, vector<1x2xf32>,
    return
  }
  func.func @transform_0(%arg0: i32) -> (i32, i32) {
    %c0_i32 = arith.constant 0 : i32
    %c0_i32_0 = arith.constant 0 : i32
    return %arg0, %c0_i32 : i32, i32
  }
  func.func @transform_1(%arg0: i32) -> (i32, i32) {
    %c0_i32 = arith.constant 0 : i32
    %c0_i32_0 = arith.constant 0 : i32
    %c0_i32_1 = arith.constant 0 : i32
    return %c0_i32, %c0_i32_0 : i32, i32
  }
  func.func @transform_2(%arg0: i32) -> (i32, i32) {
    %c0_i32 = arith.constant 0 : i32
    %c0_i32_0 = arith.constant 0 : i32
    %c0_i32_1 = arith.constant 0 : i32
    return %c0_i32, %c0_i32_0 : i32, i32
  }
  func.func @transform_3(%arg0: i32) -> (i32, i32) {
    %c0_i32 = arith.constant 0 : i32
    %c0_i32_0 = arith.constant 0 : i32
    %c0_i32_1 = arith.constant 0 : i32
    return %c0_i32, %c0_i32_0 : i32, i32
  }
  func.func @transform_4(%arg0: i32) -> (i32, i32) {
    %c0_i32 = arith.constant 0 : i32
    %c0_i32_0 = arith.constant 0 : i32
    %c0_i32_1 = arith.constant 0 : i32
    return %c0_i32, %c0_i32_0 : i32, i32
  }
  func.func @transform_5(%arg0: i32) -> (i32, i32) {
    %c0_i32 = arith.constant 0 : i32
    %c0_i32_0 = arith.constant 0 : i32
    %c0_i32_1 = arith.constant 0 : i32
    return %c0_i32, %c0_i32_0 : i32, i32
  }
  func.func @transform_6(%arg0: i32) -> (i32, i32) {
    %c0_i32 = arith.constant 0 : i32
    %c0_i32_0 = arith.constant 0 : i32
    %c0_i32_1 = arith.constant 0 : i32
    return %c0_i32, %c0_i32_0 : i32, i32
  }
  func.func @transform_7(%arg0: i32) -> (i32, i32) {
    %c0_i32 = arith.constant 0 : i32
    %c0_i32_0 = arith.constant 0 : i32
    %c0_i32_1 = arith.constant 0 : i32
    return %c0_i32, %c0_i32_0 : i32, i32
  }
  func.func @transform_8(%arg0: i32) -> (i32, i32) {
    %c0_i32 = arith.constant 0 : i32
    %c0_i32_0 = arith.constant 0 : i32
    %c0_i32_1 = arith.constant 0 : i32
    return %c0_i32, %c0_i32_0 : i32, i32
  }
  func.func @transform_9(%arg0: i32) -> (i32, i32) {
    %c0_i32 = arith.constant 0 : i32
    %c0_i32_0 = arith.constant 0 : i32
    return %c0_i32, %arg0 : i32, i32
  }
}

</mosaic_0001>

<bundles_post_ra>
// kernel: discriminator_forward.1
= control target key start
LH: loop header
LB: loop body
LE: loop exit
PB: predicated region body
PF: predicated region fallthrough
CT: control target
= control target key end

     0   :  { %s793_s0 = inlined_call_operand.vmem [shape: f32[2,8], index: 0, kind: input, shape index: {}]   ;;  %s794_s1 = inlined_call_operand.vmem [shape: f32[32,8], index: 1, kind: input, shape index: {}]   ;;  %s795_s2 = inlined_call_operand.vmem [shape: f32[32,1], index: 2, kind: input, shape index: {}]   ;;  %s796_s3 = inlined_call_operand.vmem [shape: f32[32,32], index: 3, kind: input, shape index: {}]   ;;  %s797_s4 = inlined_call_operand.vmem [shape: f32[32,1], index: 4, kind: input, shape index: {}]   ;;  %s798_s5 = inlined_call_operand.vmem [shape: f32[32,32], index: 5, kind: input, shape index: {}]   ;;  %s799_s6 = inlined_call_operand.vmem [shape: f32[32,1], index: 6, kind: input, shape index: {}]   ;;  %s800_s7 = inlined_call_operand.vmem [shape: f32[32,1], index: 7, kind: input, shape index: {}]   ;;  %s801_s8 = inlined_call_operand.<no memory space> [shape: f32[1,1], index: 8, kind: input, shape index: {}]   ;;  %s802_s9 = inlined_call_operand.hbm [shape: f32[1,2], index: 9, kind: output, shape index: {}]  }
   0x1   :  { %v14_v0 = vstv %s801_s8 }
   0x2   :  { %15 = vst [vmem:[#allocation2] sm:$0x1] %v14_v0 }
   0x3   :  { %v39_v1 = vld [vmem:[%s793_s0] sm:$0x3]  ;;  %vm64_vm0 = vcmask 64512   ;;  %v36_v4 = vld [vmem:[%s794_s1 + $0x8] sm:$0xff]  ;;  %v621_v5 = vmov 0   ;;  %v42_v6 = vld [vmem:[%s795_s2 + $0x10] sm:$0xff] }
   0x4   :  { %v35_v2 = vld [vmem:[%s794_s1] sm:$0xff]  ;;  %537 = vmatprep.subr.msk.mxu0 %vm64_vm0, %v39_v1  ;;  %591 = vset.pattern.permute.xlu0 %v621_v5  ;;  %v37_v7 = vld [vmem:[%s794_s1 + $0x10] sm:$0xff]  ;;  %v41_v8 = vld [vmem:[%s795_s2 + $0x8] sm:$0xff] }
   0x5   :  { %539 = vmatprep.mubr.msk.f32.mxu0 %vm64_vm0, %v35_v2  ;;  %v40_v3 = vld [vmem:[%s795_s2] sm:$0xff]  ;;  %538 = vmatpush3.xpose.msk.msra.mxu0 %vm64_vm0, %v39_v1  ;;  %v43_v9 = vld [vmem:[%s795_s2 + $0x18] sm:$0xff] }
   0x6   :  { %46 = vperm.xlu0 %591, %v40_v3   ;;  %592 = vset.pattern.permute.xlu1 %v621_v5  ;;  %v38_v10 = vld [vmem:[%s794_s1 + $0x18] sm:$0xff] }
   0x7   :  { %56 = vperm.xlu1 %592, %v42_v6  }
   0x8   :  { %540 = vmatmul.mubr.msk.f32.vlgmr.msra.gmra.mrb[0].mxu0 %vm64_vm0, %v36_v4 }
   0x9   :  { %542 = vmatprep.mubr.msk.f32.mxu0 %vm64_vm0, %v37_v7 }
   0xa   :  { %51 = vperm.xlu0 %591, %v41_v8  }
   0xb   :  { %16 = vsyncpa [#allocation4], 0  ;;  %v173_v11 = vld [vmem:[%s797_s4] sm:$0xff]  ;;  %61 = vperm.xlu1 %592, %v43_v9   ;;  %v174_v12 = vld [vmem:[%s797_s4 + $0x8] sm:$0xff]  ;;  %vm197_vm1 = vcmask 261120   ;;  %vm456_vm2 = vcmask 15360  }
   0xc   :  { %543 = vmatmul.mubr.msk.f32.gmra.mrb[2].mxu0 %vm64_vm0, %v38_v10  ;;  %v175_v13 = vld [vmem:[%s797_s4 + $0x10] sm:$0xff]  ;;  %v176_v14 = vld [vmem:[%s797_s4 + $0x18] sm:$0xff]  ;;  %v303_v15 = vld [vmem:[%s799_s6] sm:$0xff]  ;;  %vm487_vm3 = vcmask 8192  }
   0xd   :  { %v304_v16 = vld [vmem:[%s799_s6 + $0x8] sm:$0xff]  ;;  %v305_v17 = vld [vmem:[%s799_s6 + $0x10] sm:$0xff]  ;;  %v306_v18 = vld [vmem:[%s799_s6 + $0x18] sm:$0xff] }
   0xe   :  { %179 = vperm.xlu0 %591, %v173_v11   ;;  %v428_v19 = vld [vmem:[%s800_s7] sm:$0xff]  ;;  %v429_v20 = vld [vmem:[%s800_s7 + $0x8] sm:$0xff]  ;;  %v430_v21 = vld [vmem:[%s800_s7 + $0x10] sm:$0xff] }
   0xf   :  { %184 = vperm.xlu1 %592, %v174_v12   ;;  %v431_v22 = vld [vmem:[%s800_s7 + $0x18] sm:$0xff]  ;;  %v470_v23 = vld [vmem:[#allocation2] sm:$0x1]  ;;  %v170_v43 = vld [vmem:[%s796_s3 + $0x8] sm:$0xff] }
  0x10   :  { %v169_v24 = vld [vmem:[%s796_s3] sm:$0xff]  ;;  %v171_v44 = vld [vmem:[%s796_s3 + $0x10] sm:$0xff]  ;;  %v172_v45 = vld [vmem:[%s796_s3 + $0x18] sm:$0xff] }
  0x11   :  { %553 = vmatprep.mubr.msk.f32.mxu1 %vm197_vm1, %v169_v24  ;;  %v299_v46 = vld [vmem:[%s798_s5] sm:$0xff]  ;;  %v300_v1 = vld [vmem:[%s798_s5 + $0x8] sm:$0xff]  ;;  %v301_v2 = vld [vmem:[%s798_s5 + $0x10] sm:$0xff] }
  0x12   :  { %189 = vperm.xlu0 %591, %v175_v13   ;;  %567 = vmatprep.mubr.msk.f32.mxu0 %vm197_vm1, %v299_v46  ;;  %v302_v3 = vld [vmem:[%s798_s5 + $0x18] sm:$0xff]  ;;  %s622_s5 = smov [#allocation3]  }
  0x13   :  { %194 = vperm.xlu1 %592, %v176_v14   ;;  %s495_s15 = sshll.u32 %s622_s5, 4  ;;  %s496_s15 = int_to_ptr.vmem [resolvable:$true] %s495_s15 }
  0x14   :  { %s597_s16 = scalar_lea.vmem %s496_s15, 16  ;;  %s601_s8 = scalar_lea.vmem %s496_s15, 32 }
  0x15   :  { %p598_p0 = scmp.ne.s32.totalorder %s496_s15, %s597_s16  ;;  %p602_p1 = scmp.lt.s32.totalorder %s496_s15, %s496_s15 }
  0x16   :  { %309 = vperm.xlu0 %591, %v303_v15   ;;  %p603_p2 = scmp.lt.s32.totalorder %s601_s8, %s597_s16 }
  0x17   :  { %314 = vperm.xlu1 %592, %v304_v16  }
  0x18   :  { %p604_p3 = por %p603_p2, %p602_p1 }
  0x1a   :  { %319 = vperm.xlu0 %591, %v305_v17   ;;  %p605_p4 = pnand %p604_p3, %p598_p0 }
  0x1b   :  { %324 = vperm.xlu1 %592, %v306_v18  }
  0x1e   :  { %434 = vperm.xlu0 %591, %v428_v19  }
  0x1f   :  { %439 = vperm.xlu1 %592, %v429_v20  }
  0x22   :  { %444 = vperm.xlu0 %591, %v430_v21  }
  0x23   :  { %449 = vperm.xlu1 %592, %v431_v22  }
  0x26   :  { %473 = vperm.xlu0 %591, %v470_v23  }
  0x85   :  { %v47_v25 = vpop.permute.xlu0 %46 }
  0x86   :  { %v57_v26 = vpop.permute.xlu1 %56 }
  0x89   :  { %v52_v27 = vpop.permute.xlu0 %51 }
  0x8a   :  { %v62_v33 = vpop.permute.xlu1 %61 }
  0x8d   :  { %v180_v48 = vpop.permute.xlu0 %179 }
  0x8e   :  { %v185_v47 = vpop.permute.xlu1 %184 }
  0x91   :  { %v190_v57 = vpop.permute.xlu0 %189 }
  0x92   :  { %v195_v54 = vpop.permute.xlu1 %194 }
  0x95   :  { %v310_v4 = vpop.permute.xlu0 %309 }
  0x96   :  { %v315_v5 = vpop.permute.xlu1 %314 }
  0x99   :  { %v320_v6 = vpop.permute.xlu0 %319 }
  0x9a   :  { %v325_v7 = vpop.permute.xlu1 %324 }
  0x9d   :  { %v435_v12 = vpop.permute.xlu0 %434 }
  0x9e   :  { %v440_v13 = vpop.permute.xlu1 %439 }
  0xdb   :  { %v541_v28 = vpop.f32.mrb[0].mxu0 }
  0xdc   :  { %v152_v29 = vadd.f32 %v541_v28, %v52_v27  ;;  %v146_v30 = vpop.f32.mrb[1].mxu0  ;;  %v450_v27 = vpop.permute.xlu1 %449 }
  0xdd   :  { %v147_v31 = vadd.f32 %v146_v30, %v47_v25 }
  0xde   :  { %v166_v32 = vmax.f32 %v152_v29, 0.0 }
  0xdf   :  { %v165_v34 = vmax.f32 %v147_v31, 0.0  ;;  %v544_v35 = vpop.f32.mrb[2].mxu0 }
  0xe0   :  { %v162_v36 = vadd.f32 %v544_v35, %v62_v33  ;;  %v156_v37 = vpop.f32.mrb[3].mxu0 }
  0xe1   :  { %v157_v38 = vadd.f32 %v156_v37, %v57_v26  ;;  %v573_v39 = vpack.c.bf16 %v166_v32, %v165_v34  ;;  %v445_v26 = vpop.permute.xlu0 %444  ;;  %v476_v34 = vlaneseq }
  0xe2   :  { %v168_v40 = vmax.f32 %v162_v36, 0.0 }
  0xe3   :  { %v167_v41 = vmax.f32 %v157_v38, 0.0  ;;  %574 = vmatprep.subr.bf16.mxu1 %v573_v39  ;;  %v477_v37 = vshrl.u32 %v476_v34, 7 }
  0xe4   :  { %576 = vmatpush3.bf16.msra.mxu1 %v573_v39 }
  0xe5   :  { %v577_v42 = vpack.c.bf16 %v168_v40, %v167_v41  ;;  %v478_v40 = vsub.s32 0, %v477_v37 }
  0xe7   :  { %578 = vmatprep.subr.bf16.mxu1 %v577_v42 }
  0xe8   :  { %580 = vmatpush3.bf16.msra.mxu1 %v577_v42  ;;  %v474_v42 = vpop.permute.xlu0 %473 }
  0xeb   :  { %554 = vmatmul.mubr.msk.f32.vlgmr.msra.gmra.mrb[0].mxu1 %vm197_vm1, %v170_v43 }
  0xec   :  { %556 = vmatprep.mubr.msk.f32.mxu1 %vm197_vm1, %v171_v44  ;;  %v479_v44 = vrot.slane %v474_v42, %v478_v40 }
  0xef   :  { %557 = vmatmul.mubr.msk.f32.gmra.mrb[2].mxu1 %vm197_vm1, %v172_v45 }
 0x1be   :  { %v555_v49 = vpop.f32.mrb[0].mxu1 }
 0x1bf   :  { %v282_v50 = vadd.f32 %v555_v49, %v185_v47  ;;  %v276_v51 = vpop.f32.mrb[1].mxu1 }
 0x1c0   :  { %v277_v52 = vadd.f32 %v276_v51, %v180_v48 }
 0x1c1   :  { %v296_v53 = vmax.f32 %v282_v50, 0.0 }
 0x1c2   :  { %v295_v55 = vmax.f32 %v277_v52, 0.0  ;;  %v558_v56 = vpop.f32.mrb[2].mxu1 }
 0x1c3   :  { %v292_v58 = vadd.f32 %v558_v56, %v195_v54  ;;  %v286_v59 = vpop.f32.mrb[3].mxu1 }
 0x1c4   :  { %v581_v60 = vpack.c.bf16 %v296_v53, %v295_v55  ;;  %v287_v61 = vadd.f32 %v286_v59, %v190_v57 }
 0x1c5   :  { %v298_v62 = vmax.f32 %v292_v58, 0.0 }
 0x1c6   :  { %v297_v63 = vmax.f32 %v287_v61, 0.0  ;;  %582 = vmatprep.subr.bf16.mxu0 %v581_v60 }
 0x1c7   :  { %584 = vmatpush3.bf16.msra.mxu0 %v581_v60 }
 0x1c8   :  { %v585_v0 = vpack.c.bf16 %v298_v62, %v297_v63 }
 0x1ca   :  { %586 = vmatprep.subr.bf16.mxu0 %v585_v0 }
 0x1cb   :  { %588 = vmatpush3.bf16.msra.mxu0 %v585_v0 }
 0x1ce   :  { %568 = vmatmul.mubr.msk.f32.vlgmr.msra.gmra.mrb[4].mxu0 %vm197_vm1, %v300_v1 }
 0x1cf   :  { %570 = vmatprep.mubr.msk.f32.mxu0 %vm197_vm1, %v301_v2 }
 0x1d2   :  { %571 = vmatmul.mubr.msk.f32.gmra.mrb[6].mxu0 %vm197_vm1, %v302_v3 }
 0x2a1   :  { %v569_v8 = vpop.f32.mrb[4].mxu0 }
 0x2a2   :  { %v411_v9 = vadd.f32 %v569_v8, %v315_v5  ;;  %v405_v10 = vpop.f32.mrb[5].mxu0 }
 0x2a3   :  { %v406_v11 = vadd.f32 %v405_v10, %v310_v4 }
 0x2a4   :  { %v425_v14 = vmax.f32 %v411_v9, 0.0 }
 0x2a5   :  { %v424_v15 = vmax.f32 %v406_v11, 0.0  ;;  %v572_v16 = vpop.f32.mrb[6].mxu0 }
 0x2a6   :  { %v453_v17 = vmul.f32 %v440_v13, %v425_v14  ;;  %v421_v18 = vadd.f32 %v572_v16, %v325_v7  ;;  %v415_v19 = vpop.f32.mrb[7].mxu0 }
 0x2a7   :  { %v452_v20 = vmul.f32 %v435_v12, %v424_v15  ;;  %v416_v21 = vadd.f32 %v415_v19, %v320_v6 }
 0x2a8   :  { %v458_v22 = vsel %vm456_vm2, %v453_v17, 0.0  ;;  %v427_v23 = vmax.f32 %v421_v18, 0.0 }
 0x2a9   :  { %v457_v24 = vsel %vm456_vm2, %v452_v20, 0.0  ;;  %v426_v25 = vmax.f32 %v416_v21, 0.0 }
 0x2aa   :  { %v459_v28 = vadd.f32 %v458_v22, %v457_v24  ;;  %v455_v29 = vmul.f32 %v450_v27, %v427_v23 }
 0x2ab   :  { %v454_v30 = vmul.f32 %v445_v26, %v426_v25 }
 0x2ac   :  { %v462_v33 = vsel %vm456_vm2, %v455_v29, 0.0 }
 0x2ad   :  { %v460_v31 = vsel %vm456_vm2, %v454_v30, 0.0 }
 0x2ae   :  { %v461_v32 = vadd.f32 %v460_v31, %v459_v28 }
 0x2b0   :  { %v463_v35 = vadd.f32 %v462_v33, %v461_v32 }
 0x2b2   :  { %v464_v36 = vrot.slane %v463_v35, 4 }
 0x2b4   :  { %v465_v38 = vadd.f32 %v464_v36, %v463_v35 }
 0x2b6   :  { %v466_v39 = vrot.slane %v465_v38, 2 }
 0x2b8   :  { %v467_v41 = vadd.f32 %v466_v39, %v465_v38 }
 0x2ba   :  { %v468_v43 = vrot.slane %v467_v41, 1 }
 0x2bc   :  { %v469_v45 = vadd.f32 %v468_v43, %v467_v41 }
 0x2be   :  { %v480_v46 = vadd.f32 %v479_v44, %v469_v45 }
 0x2c0   :  { %v481_v47 = vsub.f32 0.0, %v480_v46 }
 0x2c2   :  { %v482_v48 = vmul.f32 1.442695, %v481_v47 }
 0x2c4   :  { %593 = vpow2.f32 %v482_v48 }
 0x2ce   :  { %v594_v49 = vpop.eup %593 }
 0x2cf   :  { %v484_v50 = vadd.f32 1.0, %v594_v49 }
 0x2d1   :  { %595 = vrcp.f32 %v484_v50 }
 0x2db   :  { %v596_v51 = vpop.eup %595 }
 0x2dc   :  { %488 = vst.msk [vmem:[#allocation3] sm:$0x1] %vm487_vm3, %v596_v51 }
 0x2dd   :  { %608 = shalt.err (!%p605_p4)
}
 0x2de   :  { %s609_s4 = scalar_lea.hbm %s802_s9, 16 }
 0x2df   :  { %p610_p5 = scmp.ne.s32.totalorder %s802_s9, %s609_s4  ;;  %p613_p6 = scmp.lt.u32.totalorder %s609_s4, %s802_s9 }
 0x2e1   :  { %p615_p7 = pnand %p613_p6, %p610_p5 }
 0x2e3   :  { %618 = shalt.err (!%p615_p7)
}
 0x2e4   :  { %498 = dma.vmem_to_hbm [thread:$0]  %s496_s15, 16, %s802_s9, [#allocation4]  }
 0x2e5   :  { %619 = dma.done.wait [#allocation4], 16  }
 0x2e6   :  { %620 = vsyncadd [#allocation4], 4294967280 }
 0x2e7   :  { %502 = vsyncpa [#allocation4], 1 }

</bundles_post_ra>
